<compile_context>
chip_gen: v7x
topology: tpu7x:2x2x1
jax: 0.10.0
libtpu: 0.0.40
codegen_flags: <defaults>
</compile_context>

<pallas_src>
import functools
import math

import jax
import jax.numpy as jnp
from jax.experimental import pallas as pl
from jax.experimental.pallas import tpu as pltpu


def _round_up(n, m):
    return ((n + m - 1) // m) * m


def _device_kind():
    try:
        return jax.devices()[0].device_kind.lower()
    except Exception:
        return ""


def _elu(z):
    # PyTorch nn.ELU(alpha=1.0): z if z > 0 else exp(z) - 1.
    # exp argument clamped so the discarded positive branch cannot overflow.
    one = jnp.asarray(1.0, z.dtype)
    zero = jnp.asarray(0.0, z.dtype)
    return jnp.where(z > zero, z, jnp.exp(jnp.minimum(z, zero)) - one)


def prpsy_kernel(x_ref,
                 w1_ref, b1_ref,
                 w2_ref, b2_ref,
                 w3_ref, b3_ref,
                 wl_ref, bl_ref,
                 out_ref, *, elu_dtype):
    """x arrives in natural (tile_b, D) layout; hidden activations run
    transposed as (D, tile_b) with the batch on the 128-wide lane axis."""
    cdt = w1_ref.dtype                      # matmul compute dtype (bf16 or f32)
    xin = x_ref[...].astype(cdt)            # (tile_b, D_pad)

    # Layer 1: contract the feature axis of x directly (no wrapper transpose);
    # result is (D_pad, tile_b) with batch on lanes.
    z = jax.lax.dot_general(
        w1_ref[...], xin,
        dimension_numbers=(((1,), (1,)), ((), ())),
        preferred_element_type=jnp.float32)                       # MXU, f32 acc
    h = _elu((z + b1_ref[...]).astype(elu_dtype)).astype(cdt)

    # Layers 2-3: [Linear -> ELU -> Dropout(identity at inference)]
    # TODO(synk): training-mode Dropout (stochastic masking via
    #             pltpu.prng_random_bits) is not implemented; eval semantics only.
    for w_ref, b_ref in ((w2_ref, b2_ref), (w3_ref, b3_ref)):
        z = jnp.dot(w_ref[...], h, preferred_element_type=jnp.float32)   # MXU
        h = _elu((z + b_ref[...]).astype(elu_dtype)).astype(cdt)

    # Logit layer Linear(D, 1): VPU multiply + sublane (feature-axis) reduce
    # instead of an N=1 MXU matmul -> lane-dense (1, tile_b) output row.
    # No sigmoid: PrpsyNetwork.forward returns raw logits.
    hf = h.astype(jnp.float32)
    logit = jnp.sum(hf * wl_ref[...], axis=0, keepdims=True) + bl_ref[0, 0]
    out_ref[...] = logit.astype(out_ref.dtype)


def prpsy_forward(x, params, *, tile_b=None, matmul_dtype=jnp.bfloat16,
                  elu_dtype=None):
    """x: [B, D] float32. params: PyTorch-layout (out,in) weights and 1-D biases.

    Returns [B, 1] float32 logits, identical semantics to PrpsyNetwork.forward.
    """
    B, D = x.shape
    f32 = jnp.float32

    kind = _device_kind()
    is_v5e = ("v5e" in kind) or ("v5 lite" in kind) or ("v5litepod" in kind)
    is_v7 = ("v7" in kind) or ("7x" in kind)

    c_item = jnp.dtype(matmul_dtype).itemsize
    sub = 16 if c_item == 2 else 8
    D_pad = _round_up(D, sub)               # sublane-only padding (no 128 pad)

    if elu_dtype is None:
        # bf16 VPU/EUP on v6e/v7x; v5e keeps the f32 ELU path.
        elu_dtype = matmul_dtype if (c_item == 2 and not is_v5e) else f32

    # ---- batch tiling -----------------------------------------------------
    # Large tiles amortize the ~0.35us per-grid-step overhead; VMEM use at
    # small D is only a few MiB so this fits every generation.  On v7x keep a
    # smaller cap (64 MiB VMEM) and an even number of >=2 "parallel" tiles so
    # both TensorCores get work.
    if tile_b is None:
        tile_b = 4096 if is_v7 else 8192
    num_tiles = -(-B // tile_b)
    if is_v7:
        if num_tiles == 1 and B >= 256:
            num_tiles = 2
        elif num_tiles > 1 and (num_tiles % 2):
            num_tiles += 1
    if num_tiles == 1:
        tile_b = max(_round_up(B, 8), 8)    # single tile: block == full array
    else:
        tile_b = _round_up(-(-B // num_tiles), 128)   # lane-dense output tiles
    B_pad = num_tiles * tile_b

    # ---- operands (zero padding is exact: ELU(0)=0, padded weights/bias=0) --
    x_in = x.astype(f32)
    if (B_pad != B) or (D_pad != D):
        x_in = jnp.pad(x_in, ((0, B_pad - B), (0, D_pad - D)))

    def pad_w(w):                           # (D, D) (out,in) -> (D_pad, D_pad)
        return jnp.pad(w.astype(f32),
                       ((0, D_pad - D), (0, D_pad - D))).astype(matmul_dtype)

    def pad_col(v):                         # (D,) -> (D_pad, 1) f32 column
        return jnp.pad(v.astype(f32).reshape(-1), (0, D_pad - D)).reshape(D_pad, 1)

    w1, w2, w3 = pad_w(params["w1"]), pad_w(params["w2"]), pad_w(params["w3"])
    b1, b2, b3 = pad_col(params["b1"]), pad_col(params["b2"]), pad_col(params["b3"])
    wl = pad_col(params["wl"].reshape(-1))          # logit weight column, f32
    bl = params["bl"].astype(f32).reshape(1, 1)     # scalar logit bias -> SMEM

    # ---- compiler hints -----------------------------------------------------
    flops = 2 * B_pad * D_pad * (3 * D_pad + 1)
    transcendentals = 3 * B_pad * D_pad
    bytes_accessed = (B_pad * D_pad * 4 + 3 * D_pad * D_pad * c_item
                      + 4 * D_pad * 4 + 4 + B_pad * 4)
    # double-buffered x tile (f32) + weights + lane-padded bias columns
    # + out tile + live f32 z / exp / h temporaries.
    vmem_est = (2 * tile_b * D_pad * 4
                + 2 * 3 * D_pad * D_pad * c_item
                + 2 * 4 * D_pad * 128 * 4
                + 2 * 8 * tile_b * 4
                + 4 * D_pad * tile_b * 4)
    vmem_limit = int(min(max(2 * vmem_est, 8 * 1024 * 1024), 48 * 1024 * 1024))

    kernel = functools.partial(prpsy_kernel, elu_dtype=elu_dtype)
    full = lambda shape: pl.BlockSpec(shape, lambda i: (0, 0))

    out_wide = pl.pallas_call(
        kernel,
        out_shape=jax.ShapeDtypeStruct((1, B_pad), f32),
        grid_spec=pltpu.PrefetchScalarGridSpec(
            num_scalar_prefetch=0,
            grid=(num_tiles,),
            in_specs=[
                pl.BlockSpec((tile_b, D_pad), lambda i: (i, 0)),      # x tile
                full((D_pad, D_pad)), full((D_pad, 1)),               # layer 1
                full((D_pad, D_pad)), full((D_pad, 1)),               # layer 2
                full((D_pad, D_pad)), full((D_pad, 1)),               # layer 3
                full((D_pad, 1)),                                     # logit weight
                pl.BlockSpec(memory_space=pltpu.MemorySpace.SMEM),    # logit bias
            ],
            out_specs=pl.BlockSpec((1, tile_b), lambda i: (0, i)),    # lane-dense
        ),
        compiler_params=pltpu.CompilerParams(
            dimension_semantics=("parallel",),
            vmem_limit_bytes=vmem_limit),
        cost_estimate=pl.CostEstimate(flops=flops,
                                      transcendentals=transcendentals,
                                      bytes_accessed=bytes_accessed),
    )(x_in, w1, b1, w2, b2, w3, b3, wl, bl)

    # Layout plumbing back to the PyTorch output shape [B, 1].
    return out_wide[0, :B].reshape(B, 1)


def init_params(base_dim, key):
    """Matches init_weights(): W ~ N(0, 1/sqrt(fan_in)), bias = 0.
    Weights kept in PyTorch (out_features, in_features) layout."""
    keys = jax.random.split(key, 4)
    std = 1.0 / math.sqrt(base_dim)

    def lin(k, dout, din):
        w = std * jax.random.normal(k, (dout, din), dtype=jnp.float32)
        return w, jnp.zeros((dout,), dtype=jnp.float32)

    w1, b1 = lin(keys[0], base_dim, base_dim)
    w2, b2 = lin(keys[1], base_dim, base_dim)
    w3, b3 = lin(keys[2], base_dim, base_dim)
    wl, bl = lin(keys[3], 1, base_dim)
    return {"w1": w1, "b1": b1, "w2": w2, "b2": b2,
            "w3": w3, "b3": b3, "wl": wl, "bl": bl}


def prpsy_reference(x, params):
    """Pure-JAX f32 reference mirroring PrpsyNetwork.forward (eval mode)."""
    h = x.astype(jnp.float32)
    for wk, bk in (("w1", "b1"), ("w2", "b2"), ("w3", "b3")):
        z = jnp.dot(h, params[wk].T,
                    preferred_element_type=jnp.float32,
                    precision=jax.lax.Precision.HIGHEST)
        h = _elu(z + params[bk][None, :])
    return (jnp.sum(h * params["wl"], axis=-1, keepdims=True)
            + params["bl"][None, :])


if __name__ == "__main__":
    base_dim = 32          # propensity-net feature dim (stays 32, no 128 pad)
    batch = 300            # exercises batch padding and a multi-step grid

    key = jax.random.PRNGKey(0)
    k_x, k_p = jax.random.split(key)
    x = jax.random.normal(k_x, (batch, base_dim), dtype=jnp.float32)
    params = init_params(base_dim, k_p)

    ref = prpsy_reference(x, params)

    # float32 path (exact PyTorch forward semantics), small tiles -> multi-step grid.
    out_f32 = jax.block_until_ready(
        prpsy_forward(x, params, tile_b=128, matmul_dtype=jnp.float32))
    assert out_f32.shape == (batch, 1)
    assert jnp.allclose(out_f32, ref, atol=2e-2, rtol=2e-2), (
        float(jnp.max(jnp.abs(out_f32 - ref))))

    # Default path: bf16 matmuls (f32 MXU accumulation), bf16 ELU on v6e/v7x,
    # auto-chosen large batch tile (single tile here; 2 tiles on v7x).
    out_def = jax.block_until_ready(prpsy_forward(x, params))
    assert out_def.shape == (batch, 1)
    assert jnp.allclose(out_def, ref, atol=8e-2, rtol=8e-2), (
        float(jnp.max(jnp.abs(out_def - ref))))

    print("KERNEL_OK")
</pallas_src>

<mosaic_0001>
module attributes {stable_mosaic.version = 11 : i64} {
  func.func @prpsy_kernel(%arg0: i32, %arg1: memref<128x32xf32, #tpu.memory_space<vmem>>, %arg2: memref<32x32xf32, #tpu.memory_space<vmem>>, %arg3: memref<32x1xf32, #tpu.memory_space<vmem>>, %arg4: memref<32x32xf32, #tpu.memory_space<vmem>>, %arg5: memref<32x1xf32, #tpu.memory_space<vmem>>, %arg6: memref<32x32xf32, #tpu.memory_space<vmem>>, %arg7: memref<32x1xf32, #tpu.memory_space<vmem>>, %arg8: memref<32x1xf32, #tpu.memory_space<vmem>>, %arg9: memref<1x1xf32, #tpu.memory_space<smem>>, %arg10: memref<1x128xf32, #tpu.memory_space<vmem>>) attributes {dimension_semantics = [#tpu.dimension_semantics<parallel>], iteration_bounds = array<i64: 3>, scalar_prefetch = 0 : i64, scratch_operands = 0 : i64, tpu.core_type = #tpu.core_type<tc>, window_params = [{transform_indices = @transform_0, window_bounds = array<i64: 128, 32>}, {pipeline_mode = #tpu.pipeline_mode<synchronous>, transform_indices = @transform_1, window_bounds = array<i64: 32, 32>}, {pipeline_mode = #tpu.pipeline_mode<synchronous>, transform_indices = @transform_2, window_bounds = array<i64: 32, 1>}, {pipeline_mode = #tpu.pipeline_mode<synchronous>, transform_indices = @transform_3, window_bounds = array<i64: 32, 32>}, {pipeline_mode = #tpu.pipeline_mode<synchronous>, transform_indices = @transform_4, window_bounds = array<i64: 32, 1>}, {pipeline_mode = #tpu.pipeline_mode<synchronous>, transform_indices = @transform_5, window_bounds = array<i64: 32, 32>}, {pipeline_mode = #tpu.pipeline_mode<synchronous>, transform_indices = @transform_6, window_bounds = array<i64: 32, 1>}, {pipeline_mode = #tpu.pipeline_mode<synchronous>, transform_indices = @transform_7, window_bounds = array<i64: 32, 1>}, {transform_indices = @transform_8, window_bounds = array<i64: 1, 1>}, {transform_indices = @transform_9, window_bounds = array<i64: 1, 128>}]} {
    %c0 = arith.constant 0 : index
    %c0_0 = arith.constant 0 : index
    %0 = vector.load %arg1[%c0, %c0_0] : memref<128x32xf32, #tpu.memory_space<vmem>>, vector<128x32xf32>
    %c0_1 = arith.constant 0 : index
    %c0_2 = arith.constant 0 : index
    %1 = vector.load %arg2[%c0_1, %c0_2] : memref<32x32xf32, #tpu.memory_space<vmem>>, vector<32x32xf32>
    %cst = arith.constant dense<0.000000e+00> : vector<32x128xf32>
    %2 = tpu.matmul %1, %0, %cst {dimension_numbers = #tpu.dot_dimension_numbers<[1], [1], [0], [0], [0, 0, 1, 0], [], []>} : vector<32x32xf32>, vector<128x32xf32>, vector<32x128xf32> -> vector<32x128xf32>
    %c0_3 = arith.constant 0 : index
    %c0_4 = arith.constant 0 : index
    %3 = vector.load %arg3[%c0_3, %c0_4] : memref<32x1xf32, #tpu.memory_space<vmem>>, vector<32x1xf32>
    %4 = vector.broadcast %3 : vector<32x1xf32> to vector<32x128xf32>
    %5 = arith.addf %2, %4 : vector<32x128xf32>
    %cst_5 = arith.constant 0.000000e+00 : f32
    %6 = vector.broadcast %cst_5 : f32 to vector<32x128xf32>
    %7 = arith.cmpf ogt, %5, %6 : vector<32x128xf32>
    %cst_6 = arith.constant 0.000000e+00 : f32
    %8 = vector.broadcast %cst_6 : f32 to vector<32x128xf32>
    %9 = arith.minimumf %5, %8 : vector<32x128xf32>
    %10 = math.exp %9 : vector<32x128xf32>
    %cst_7 = arith.constant 1.000000e+00 : f32
    %11 = vector.broadcast %cst_7 : f32 to vector<32x128xf32>
    %12 = arith.subf %10, %11 : vector<32x128xf32>
    %13 = arith.select %7, %5, %12 : vector<32x128xi1>, vector<32x128xf32>
    %c0_8 = arith.constant 0 : index
    %c0_9 = arith.constant 0 : index
    %14 = vector.load %arg4[%c0_8, %c0_9] : memref<32x32xf32, #tpu.memory_space<vmem>>, vector<32x32xf32>
    %cst_10 = arith.constant dense<0.000000e+00> : vector<32x128xf32>
    %15 = tpu.matmul %14, %13, %cst_10 {dimension_numbers = #tpu.dot_dimension_numbers<[1], [0], [0], [1], [0, 0, 1, 1], [], []>} : vector<32x32xf32>, vector<32x128xf32>, vector<32x128xf32> -> vector<32x128xf32>
    %c0_11 = arith.constant 0 : index
    %c0_12 = arith.constant 0 : index
    %16 = vector.load %arg5[%c0_11, %c0_12] : memref<32x1xf32, #tpu.memory_space<vmem>>, vector<32x1xf32>
    %17 = vector.broadcast %16 : vector<32x1xf32> to vector<32x128xf32>
    %18 = arith.addf %15, %17 : vector<32x128xf32>
    %cst_13 = arith.constant 0.000000e+00 : f32
    %19 = vector.broadcast %cst_13 : f32 to vector<32x128xf32>
    %20 = arith.cmpf ogt, %18, %19 : vector<32x128xf32>
    %cst_14 = arith.constant 0.000000e+00 : f32
    %21 = vector.broadcast %cst_14 : f32 to vector<32x128xf32>
    %22 = arith.minimumf %18, %21 : vector<32x128xf32>
    %23 = math.exp %22 : vector<32x128xf32>
    %cst_15 = arith.constant 1.000000e+00 : f32
    %24 = vector.broadcast %cst_15 : f32 to vector<32x128xf32>
    %25 = arith.subf %23, %24 : vector<32x128xf32>
    %26 = arith.select %20, %18, %25 : vector<32x128xi1>, vector<32x128xf32>
    %c0_16 = arith.constant 0 : index
    %c0_17 = arith.constant 0 : index
    %27 = vector.load %arg6[%c0_16, %c0_17] : memref<32x32xf32, #tpu.memory_space<vmem>>, vector<32x32xf32>
    %cst_18 = arith.constant dense<0.000000e+00> : vector<32x128xf32>
    %28 = tpu.matmul %27, %26, %cst_18 {dimension_numbers = #tpu.dot_dimension_numbers<[1], [0], [0], [1], [0, 0, 1, 1], [], []>} : vector<32x32xf32>, vector<32x128xf32>, vector<32x128xf32> -> vector<32x128xf32>
    %c0_19 = arith.constant 0 : index
    %c0_20 = arith.constant 0 : index
    %29 = vector.load %arg7[%c0_19, %c0_20] : memref<32x1xf32, #tpu.memory_space<vmem>>, vector<32x1xf32>
    %30 = vector.broadcast %29 : vector<32x1xf32> to vector<32x128xf32>
    %31 = arith.addf %28, %30 : vector<32x128xf32>
    %cst_21 = arith.constant 0.000000e+00 : f32
    %32 = vector.broadcast %cst_21 : f32 to vector<32x128xf32>
    %33 = arith.cmpf ogt, %31, %32 : vector<32x128xf32>
    %cst_22 = arith.constant 0.000000e+00 : f32
    %34 = vector.broadcast %cst_22 : f32 to vector<32x128xf32>
    %35 = arith.minimumf %31, %34 : vector<32x128xf32>
    %36 = math.exp %35 : vector<32x128xf32>
    %cst_23 = arith.constant 1.000000e+00 : f32
    %37 = vector.broadcast %cst_23 : f32 to vector<32x128xf32>
    %38 = arith.subf %36, %37 : vector<32x128xf32>
    %39 = arith.select %33, %31, %38 : vector<32x128xi1>, vector<32x128xf32>
    %c0_24 = arith.constant 0 : index
    %c0_25 = arith.constant 0 : index
    %40 = vector.load %arg8[%c0_24, %c0_25] : memref<32x1xf32, #tpu.memory_space<vmem>>, vector<32x1xf32>
    %41 = vector.broadcast %40 : vector<32x1xf32> to vector<32x128xf32>
    %42 = arith.mulf %39, %41 : vector<32x128xf32>
    %cst_26 = arith.constant dense<0.000000e+00> : vector<128xf32>
    %43 = vector.multi_reduction <add>, %42, %cst_26 [0] : vector<32x128xf32> to vector<128xf32>
    %44 = vector.shape_cast %43 : vector<128xf32> to vector<1x128xf32>
    %c0_27 = arith.constant 0 : index
    %c0_28 = arith.constant 0 : index
    %45 = memref.load %arg9[%c0_27, %c0_28] : memref<1x1xf32, #tpu.memory_space<smem>>
    %46 = vector.broadcast %45 : f32 to vector<1x128xf32>
    %47 = arith.addf %44, %46 : vector<1x128xf32>
    %c0_29 = arith.constant 0 : index
    %c0_30 = arith.constant 0 : index
    %48 = vector.load %arg10[%c0_29, %c0_30] : memref<1x128xf32, #tpu.memory_space<vmem>>, vector<1x128xf32>
    tpu.vector_store %arg10[%c0_29, %c0_30], %47 {strides = array<i32>} : memref<1x128xf32, #tpu.memory_space<vmem>>, vector<1x128xf32>,
    return
  }
  func.func @transform_0(%arg0: i32) -> (i32, i32) {
    %c0_i32 = arith.constant 0 : i32
    %c0_i32_0 = arith.constant 0 : i32
    return %arg0, %c0_i32 : i32, i32
  }
  func.func @transform_1(%arg0: i32) -> (i32, i32) {
    %c0_i32 = arith.constant 0 : i32
    %c0_i32_0 = arith.constant 0 : i32
    %c0_i32_1 = arith.constant 0 : i32
    return %c0_i32, %c0_i32_0 : i32, i32
  }
  func.func @transform_2(%arg0: i32) -> (i32, i32) {
    %c0_i32 = arith.constant 0 : i32
    %c0_i32_0 = arith.constant 0 : i32
    %c0_i32_1 = arith.constant 0 : i32
    return %c0_i32, %c0_i32_0 : i32, i32
  }
  func.func @transform_3(%arg0: i32) -> (i32, i32) {
    %c0_i32 = arith.constant 0 : i32
    %c0_i32_0 = arith.constant 0 : i32
    %c0_i32_1 = arith.constant 0 : i32
    return %c0_i32, %c0_i32_0 : i32, i32
  }
  func.func @transform_4(%arg0: i32) -> (i32, i32) {
    %c0_i32 = arith.constant 0 : i32
    %c0_i32_0 = arith.constant 0 : i32
    %c0_i32_1 = arith.constant 0 : i32
    return %c0_i32, %c0_i32_0 : i32, i32
  }
  func.func @transform_5(%arg0: i32) -> (i32, i32) {
    %c0_i32 = arith.constant 0 : i32
    %c0_i32_0 = arith.constant 0 : i32
    %c0_i32_1 = arith.constant 0 : i32
    return %c0_i32, %c0_i32_0 : i32, i32
  }
  func.func @transform_6(%arg0: i32) -> (i32, i32) {
    %c0_i32 = arith.constant 0 : i32
    %c0_i32_0 = arith.constant 0 : i32
    %c0_i32_1 = arith.constant 0 : i32
    return %c0_i32, %c0_i32_0 : i32, i32
  }
  func.func @transform_7(%arg0: i32) -> (i32, i32) {
    %c0_i32 = arith.constant 0 : i32
    %c0_i32_0 = arith.constant 0 : i32
    %c0_i32_1 = arith.constant 0 : i32
    return %c0_i32, %c0_i32_0 : i32, i32
  }
  func.func @transform_8(%arg0: i32) -> (i32, i32) {
    %c0_i32 = arith.constant 0 : i32
    %c0_i32_0 = arith.constant 0 : i32
    %c0_i32_1 = arith.constant 0 : i32
    return %c0_i32, %c0_i32_0 : i32, i32
  }
  func.func @transform_9(%arg0: i32) -> (i32, i32) {
    %c0_i32 = arith.constant 0 : i32
    %c0_i32_0 = arith.constant 0 : i32
    return %c0_i32, %arg0 : i32, i32
  }
}

</mosaic_0001>

<bundles_post_ra>
// kernel: tpu_custom_call.1
= control target key start
LH: loop header
LB: loop body
LE: loop exit
PB: predicated region body
PF: predicated region fallthrough
CT: control target
= control target key end

     0   :  { %s1605_s0 = inlined_call_operand.vmem [shape: f32[384,32], index: 0, kind: input, shape index: {}]   ;;  %s1606_s1 = inlined_call_operand.vmem [shape: f32[32,32], index: 1, kind: input, shape index: {}]   ;;  %s1607_s2 = inlined_call_operand.vmem [shape: f32[32,1], index: 2, kind: input, shape index: {}]   ;;  %s1608_s3 = inlined_call_operand.vmem [shape: f32[32,32], index: 3, kind: input, shape index: {}]   ;;  %s1609_s4 = inlined_call_operand.vmem [shape: f32[32,1], index: 4, kind: input, shape index: {}]   ;;  %s1610_s5 = inlined_call_operand.vmem [shape: f32[32,32], index: 5, kind: input, shape index: {}]   ;;  %s1611_s6 = inlined_call_operand.vmem [shape: f32[32,1], index: 6, kind: input, shape index: {}]   ;;  %s1612_s7 = inlined_call_operand.vmem [shape: f32[32,1], index: 7, kind: input, shape index: {}]   ;;  %s1613_s8 = inlined_call_operand.<no memory space> [shape: f32[1,1], index: 8, kind: input, shape index: {}]   ;;  %s1614_s9 = inlined_call_operand.hbm [shape: f32[1,384], index: 9, kind: output, shape index: {}]  }
   0x1   :  { %14 = sst [smem:[#allocation2]] %s1613_s8 }
   0x2   :  { %15 = vsyncpa [#allocation4], 0 }
   0x3   :  { %17 = vsyncpa [#allocation4 + $0x1], 0  ;;  %s1354_s11 = smov 0   ;;  %s1356_s12 = smov 0  }
   0x4   :  { %s1358_s13 = smov 0   ;;  %s1360_s14 = smov 0  }
   0x5 LB: > { %s953_s8 = sadd.s32 4294967295, %s1297_s14   ;;  %s954_s15 = sadd.s32 4294967294, %s1297_s14   ;;  %s1297_s14 = sphi %s1360_s14, %s1622_s14   ;;  %s1293_s13 = sphi %s1358_s13, %s1621_s13   ;;  %s1289_s12 = sphi %s1356_s12, %s1620_s12   ;;  %s1285_s11 = sphi %s1354_s11, %s1619_s11  }
   0x6   : > { %s1377_s16 = sadd.s32 1, %s1297_s14   ;;  %s224_s17 = sadd.s32 1, %s1293_s13 }
   0x7   : > { %s221_s18 = ssub.s32 %s1297_s14, %s1377_s16  ;;  %p234_p0 = scmp.ne.s32.totalorder %s1293_s13, %s1289_s12 }
   0x8   : > { %p222_p1 = scmp.eq.s32.totalorder %s221_s18, 0  ;;  %p235_p2 = scmp.eq.s32.totalorder %s953_s8, 2 }
   0x9   : > { %p240_p3 = scmp.ne.s32.totalorder %s1289_s12, %s1285_s11  ;;  %p241_p4 = scmp.eq.s32.totalorder %s954_s15, 2 }
   0xa   : > { %s1387_s19 = scalar_select %p222_p1, %s1293_s13, %s224_s17  }
   0xb   : > { %p1389_p5 = por %p235_p2, %p234_p0  ;;  %p1393_p6 = por %p241_p4, %p240_p3 }
   0xc   : > { %p957_p7 = scmp.ge.s32.totalorder %s1297_s14, 1  ;;  %p292_p8 = scmp.lt.s32.totalorder %s1297_s14, 4 }
   0xe   : > { %p293_p9 = pnand %p957_p7, %p292_p8 }
   0xf   : > { %s1399_s22 = sshll.u32 (!%p293_p9), %s953_s8, 4  ;;  %vm377_vm0 = vcmask (!%p293_p9), 261120   ;;  %v349_v0 = vld [vmem:[%s1606_s1] sm:$0xff] (!%p293_p9)  ;;  %v1299_v1 = vmov (!%p293_p9), 0   ;;  %v355_v3 = vld [vmem:[%s1607_s2 + $0x10] sm:$0xff] (!%p293_p9)  ;;  %v354_v4 = vld [vmem:[%s1607_s2 + $0x8] sm:$0xff] (!%p293_p9) }
  0x10   : > { %296 = sbr.rel (%p293_p9) target bundleno = 851 (0x353), region = 56  ;;  %p328_p10 = scmp.lt.s32.totalorder (!%p293_p9), %s1399_s22, 47  ;;  %1071 = vmatprep.mubr.msk.f32.mxu0 (!%p293_p9), %vm377_vm0, %v349_v0  ;;  %1209 = vset.pattern.permute.xlu0 (!%p293_p9), %v1299_v1  ;;  %v353_v2 = vld [vmem:[%s1607_s2] sm:$0xff] (!%p293_p9)  ;;  %v356_v5 = vld [vmem:[%s1607_s2 + $0x18] sm:$0xff] (!%p293_p9)  ;;  %vm1426_vm1 = vmpackc.low (!%p293_p9), %vm377_vm0, %vm377_vm0 }
  0x11   : > { %359 = vperm.xlu0 (!%p293_p9), %1209, %v353_v2   ;;  %1210 = vset.pattern.permute.xlu1 (!%p293_p9), %v1299_v1  ;;  %v551_v7 = vld [vmem:[%s1609_s4] sm:$0xff] (!%p293_p9)  ;;  %v552_v13 = vld [vmem:[%s1609_s4 + $0x8] sm:$0xff] (!%p293_p9)  ;;  %v553_v15 = vld [vmem:[%s1609_s4 + $0x10] sm:$0xff] (!%p293_p9)  ;;  %s882_s15 = sld [smem:[#allocation2]] (!%p293_p9)  ;;  %s1563_s27 = scalar_lea.hbm (!%p293_p9), %s1614_s9, %s1399_s22 }
  0x12   : > { %369 = vperm.xlu1 (!%p293_p9), %1210, %v355_v3   ;;  %v554_v16 = vld [vmem:[%s1609_s4 + $0x18] sm:$0xff] (!%p293_p9)  ;;  %v700_v19 = vld [vmem:[%s1611_s6] sm:$0xff] (!%p293_p9)  ;;  %v701_v21 = vld [vmem:[%s1611_s6 + $0x8] sm:$0xff] (!%p293_p9) }
  0x13   : > { %v702_v22 = vld [vmem:[%s1611_s6 + $0x10] sm:$0xff] (!%p293_p9)  ;;  %v703_v23 = vld [vmem:[%s1611_s6 + $0x18] sm:$0xff] (!%p293_p9)  ;;  %v845_v26 = vld [vmem:[%s1612_s7] sm:$0xff] (!%p293_p9) }
  0x14   : > { %v846_v28 = vld [vmem:[%s1612_s7 + $0x8] sm:$0xff] (!%p293_p9)  ;;  %v847_v29 = vld [vmem:[%s1612_s7 + $0x10] sm:$0xff] (!%p293_p9)  ;;  %v848_v30 = vld [vmem:[%s1612_s7 + $0x18] sm:$0xff] (!%p293_p9) }
  0x15   : > { %364 = vperm.xlu0 (!%p293_p9), %1209, %v354_v4   ;;  %v350_v43 = vld [vmem:[%s1606_s1 + $0x8] sm:$0xff] (!%p293_p9)  ;;  %v351_v44 = vld [vmem:[%s1606_s1 + $0x10] sm:$0xff] (!%p293_p9)  ;;  %v352_v45 = vld [vmem:[%s1606_s1 + $0x18] sm:$0xff] (!%p293_p9) }
  0x16   : > { %374 = vperm.xlu1 (!%p293_p9), %1210, %v356_v5   ;;  %v547_v46 = vld [vmem:[%s1608_s3] sm:$0xff] (!%p293_p9) }
  0x17   : > { %s329_s29 = scalar_select %p328_p10, %s1399_s22, 47  ;;  %1085 = vmatprep.mubr.msk.f32.mxu1 %vm377_vm0, %v547_v46 }
  0x19   : > { %s959_s17 = sshll.u32 %s329_s29, 3  ;;  %557 = vperm.xlu0 %1209, %v551_v7   ;;  %s1300_s29 = smov [#allocation3]  }
  0x1a   : > { %s1422_s24 = scalar_lea.vmem %s1605_s0, %s959_s17  ;;  %562 = vperm.xlu1 %1210, %v552_v13   ;;  %s325_s17 = sand.u32 1, %s1289_s12  }
  0x1b   : > { %v333_v8 = vld [vmem:[%s1422_s24] sm:$0xff]  ;;  %v334_v9 = vld [vmem:[%s1422_s24 + $0x8] sm:$0xff]  ;;  %v335_v10 = vld [vmem:[%s1422_s24 + $0x10] sm:$0xff]  ;;  %s326_s18 = scalar_lea.vmem [#allocation3], %s325_s17  ;;  %s887_s28 = scalar_lea.sflag [#allocation4], %s325_s17 }
  0x1c   : > { %v1105_v11 = vpack.c.bf16 %v334_v9, %v333_v8  ;;  %v336_v12 = vld [vmem:[%s1422_s24 + $0x18] sm:$0xff]  ;;  %v337_v17 = vld [vmem:[%s1422_s24 + $0x20] sm:$0xff]  ;;  %v338_v18 = vld [vmem:[%s1422_s24 + $0x28] sm:$0xff]  ;;  %s899_s23 = sshll.u32 %s326_s18, 4  ;;  %s1239_s30 = sshll.u32 %s1300_s29, 4  ;;  %s1565_s23 = int_to_ptr.vmem [resolvable:$true] %s899_s23  ;;  %s1240_s30 = int_to_ptr.vmem [resolvable:$false] %s1239_s30 }
  0x1d   : > { %v1111_v14 = vpack.c.bf16 %v336_v12, %v335_v10  ;;  %567 = vperm.xlu0 %1209, %v553_v15   ;;  %v1117_v20 = vpack.c.bf16 %v338_v18, %v337_v17  ;;  %v339_v24 = vld [vmem:[%s1422_s24 + $0x30] sm:$0xff]  ;;  %v340_v25 = vld [vmem:[%s1422_s24 + $0x38] sm:$0xff]  ;;  %v341_v31 = vld [vmem:[%s1422_s24 + $0x40] sm:$0xff]  ;;  %s1241_s10 = scalar_lea.vmem %s1240_s30, 32  ;;  %p1242_p0 = scmp.lt.s32.totalorder %s1565_s23, %s1240_s30 }
  0x1e   : > { %1107 = vmatprep.subr.msk.bf16.mxu0 %vm1426_vm1, %v1105_v11  ;;  %572 = vperm.xlu1 %1210, %v554_v16   ;;  %v1123_v27 = vpack.c.bf16 %v340_v25, %v339_v24  ;;  %v342_v32 = vld [vmem:[%s1422_s24 + $0x48] sm:$0xff]  ;;  %v343_v34 = vld [vmem:[%s1422_s24 + $0x50] sm:$0xff]  ;;  %v344_v35 = vld [vmem:[%s1422_s24 + $0x58] sm:$0xff] }
  0x1f   : > { %1110 = vmatpush3.bf16.xpose.msk.msra.mxu0 %vm1426_vm1, %v1105_v11  ;;  %v1129_v33 = vpack.c.bf16 %v342_v32, %v341_v31  ;;  %v1135_v36 = vpack.c.bf16 %v344_v35, %v343_v34  ;;  %v345_v37 = vld [vmem:[%s1422_s24 + $0x60] sm:$0xff]  ;;  %v346_v38 = vld [vmem:[%s1422_s24 + $0x68] sm:$0xff]  ;;  %v347_v40 = vld [vmem:[%s1422_s24 + $0x70] sm:$0xff] }
  0x20   : > { %1113 = vmatprep.subr.msk.bf16.mxu0 %vm1426_vm1, %v1111_v14  ;;  %v1141_v39 = vpack.c.bf16 %v346_v38, %v345_v37  ;;  %v348_v41 = vld [vmem:[%s1422_s24 + $0x78] sm:$0xff]  ;;  %v548_v17 = vld [vmem:[%s1608_s3 + $0x8] sm:$0xff]  ;;  %v549_v18 = vld [vmem:[%s1608_s3 + $0x10] sm:$0xff]  ;;  %s1235_s24 = scalar_lea.vmem %s1565_s23, 16 }
  0x21   : > { %706 = vperm.xlu0 %1209, %v700_v19   ;;  %v1147_v42 = vpack.c.bf16 %v348_v41, %v347_v40  ;;  %v550_v19 = vld [vmem:[%s1608_s3 + $0x18] sm:$0xff]  ;;  %p1236_p11 = scmp.ne.s32.totalorder %s1565_s23, %s1235_s24  ;;  %p1243_p1 = scmp.lt.s32.totalorder %s1241_s10, %s1235_s24 }
  0x22   : > { %711 = vperm.xlu1 %1210, %v701_v21  }
  0x23   : > { %p1237_p12 = pnand %p1236_p11, %p1389_p5  ;;  %p1244_p2 = por %p1243_p1, %p1242_p0 }
  0x25   : > { %716 = vperm.xlu0 %1209, %v702_v22   ;;  %p1238_p13 = pneg %p1237_p12 }
  0x26   : > { %721 = vperm.xlu1 %1210, %v703_v23  }
  0x27   : > { %1116 = vmatpush3.bf16.xpose.msk.msra.mxu0 %vm1426_vm1, %v1111_v14  ;;  %p1245_p3 = pnand %p1244_p2, %p1238_p13 }
  0x28   : > { %1119 = vmatprep.subr.msk.bf16.mxu0 %vm1426_vm1, %v1117_v20 }
  0x29   : > { %851 = vperm.xlu0 %1209, %v845_v26  }
  0x2a   : > { %856 = vperm.xlu1 %1210, %v846_v28  }
  0x2d   : > { %861 = vperm.xlu0 %1209, %v847_v29  }
  0x2e   : > { %866 = vperm.xlu1 %1210, %v848_v30  }
  0x2f   : > { %1122 = vmatpush3.bf16.xpose.msk.msra.mxu0 %vm1426_vm1, %v1117_v20  ;;  %v696_v20 = vld [vmem:[%s1610_s5] sm:$0xff] }
  0x30   : > { %1125 = vmatprep.subr.msk.bf16.mxu0 %vm1426_vm1, %v1123_v27 }
  0x37   : > { %1128 = vmatpush3.bf16.xpose.msk.msra.mxu0 %vm1426_vm1, %v1123_v27 }
  0x38   : > { %1131 = vmatprep.subr.msk.bf16.mxu0 %vm1426_vm1, %v1129_v33 }
  0x3f   : > { %1134 = vmatpush3.bf16.xpose.msk.msra.mxu0 %vm1426_vm1, %v1129_v33 }
  0x40   : > { %1137 = vmatprep.subr.msk.bf16.mxu0 %vm1426_vm1, %v1135_v36 }
  0x47   : > { %1140 = vmatpush3.bf16.xpose.msk.msra.mxu0 %vm1426_vm1, %v1135_v36 }
  0x48   : > { %1143 = vmatprep.subr.msk.bf16.mxu0 %vm1426_vm1, %v1141_v39 }
  0x4f   : > { %1146 = vmatpush3.bf16.xpose.msk.msra.mxu0 %vm1426_vm1, %v1141_v39 }
  0x50   : > { %1149 = vmatprep.subr.msk.bf16.mxu0 %vm1426_vm1, %v1147_v42 }
  0x57   : > { %1152 = vmatpush3.bf16.xpose.msk.msra.mxu0 %vm1426_vm1, %v1147_v42 }
  0x5e   : > { %1072 = vmatmul.mubr.msk.f32.vlgmr.msra.gmra.mrb[0].mxu0 %vm377_vm0, %v350_v43 }
  0x5f   : > { %1074 = vmatprep.mubr.msk.f32.mxu0 %vm377_vm0, %v351_v44 }
  0x62   : > { %1075 = vmatmul.mubr.msk.f32.gmra.mrb[2].mxu0 %vm377_vm0, %v352_v45 }
  0x90   : > { %v360_v47 = vpop.permute.xlu0 %359 }
  0x91   : > { %v370_v48 = vpop.permute.xlu1 %369 }
  0x94   : > { %v365_v49 = vpop.permute.xlu0 %364 }
  0x95   : > { %v375_v55 = vpop.permute.xlu1 %374 }
  0x98   : > { %v558_v22 = vpop.permute.xlu0 %557 }
  0x99   : > { %v563_v21 = vpop.permute.xlu1 %562 }
  0x9c   : > { %v568_v31 = vpop.permute.xlu0 %567 }
  0x9d   : > { %v573_v28 = vpop.permute.xlu1 %572 }
 0x131   : > { %v1073_v50 = vpop.f32.mrb[0].mxu0 }
 0x132   : > { %v510_v51 = vadd.f32 %v1073_v50, %v365_v49  ;;  %v504_v52 = vpop.f32.mrb[1].mxu0 }
 0x133   : > { %v505_v53 = vadd.f32 %v504_v52, %v360_v47 }
 0x134   : > { %v528_v54 = vmin.f32 %v510_v51, 0.0  ;;  %vm524_vm2 = vcmp.gt.f32.partialorder %v510_v51, 0.0 }
 0x135   : > { %v527_v56 = vmin.f32 %v505_v53, 0.0  ;;  %v1076_v57 = vpop.f32.mrb[2].mxu0  ;;  %vm523_vm3 = vcmp.gt.f32.partialorder %v505_v53, 0.0 }
 0x136   : > { %v533_v58 = vmul.f32 1.442695, %v528_v54  ;;  %v520_v59 = vadd.f32 %v1076_v57, %v375_v55  ;;  %v514_v60 = vpop.f32.mrb[3].mxu0  ;;  %v697_v55 = vld [vmem:[%s1610_s5 + $0x8] sm:$0xff]  ;;  %v699_v57 = vld [vmem:[%s1610_s5 + $0x18] sm:$0xff] }
 0x137   : > { %v531_v61 = vmul.f32 1.442695, %v527_v56  ;;  %v515_v62 = vadd.f32 %v514_v60, %v370_v48  ;;  %v698_v56 = vld [vmem:[%s1610_s5 + $0x10] sm:$0xff] }
 0x138   : > { %1211 = vpow2.f32 %v533_v58  ;;  %v530_v63 = vmin.f32 %v520_v59, 0.0  ;;  %vm526_vm4 = vcmp.gt.f32.partialorder %v520_v59, 0.0  ;;  %v712_v58 = vpop.permute.xlu1 %711 }
 0x139   : > { %1213 = vpow2.f32 %v531_v61  ;;  %v529_v0 = vmin.f32 %v515_v62, 0.0  ;;  %vm525_vm5 = vcmp.gt.f32.partialorder %v515_v62, 0.0 }
 0x13a   : > { %v537_v1 = vmul.f32 1.442695, %v530_v63 }
 0x13b   : > { %v535_v2 = vmul.f32 1.442695, %v529_v0 }
 0x13c   : > { %1215 = vpow2.f32 %v537_v1  ;;  %v722_v1 = vpop.permute.xlu1 %721 }
 0x13d   : > { %1217 = vpow2.f32 %v535_v2 }
 0x142   : > { %v1212_v3 = vpop.eup %1211 }
 0x143   : > { %v1214_v4 = vpop.eup %1213  ;;  %v981_v5 = vadd.f32 -1.0, %v1212_v3 }
 0x144   : > { %v980_v6 = vadd.f32 -1.0, %v1214_v4 }
 0x145   : > { %v544_v7 = vsel %vm524_vm2, %v510_v51, %v981_v5 }
 0x146   : > { %v1216_v8 = vpop.eup %1215  ;;  %v543_v9 = vsel %vm523_vm3, %v505_v53, %v980_v6 }
 0x147   : > { %v1218_v10 = vpop.eup %1217  ;;  %v983_v11 = vadd.f32 -1.0, %v1216_v8  ;;  %v1153_v12 = vpack.c.bf16 %v544_v7, %v543_v9 }
 0x148   : > { %v982_v13 = vadd.f32 -1.0, %v1218_v10 }
 0x149   : > { %1154 = vmatprep.subr.bf16.mxu1 %v1153_v12  ;;  %v546_v14 = vsel %vm526_vm4, %v520_v59, %v983_v11  ;;  %v707_v59 = vpop.permute.xlu0 %706 }
 0x14a   : > { %1156 = vmatpush3.bf16.msra.mxu1 %v1153_v12  ;;  %v545_v15 = vsel %vm525_vm5, %v515_v62, %v982_v13 }
 0x14b   : > { %v1157_v16 = vpack.c.bf16 %v546_v14, %v545_v15 }
 0x14d   : > { %1158 = vmatprep.subr.bf16.mxu1 %v1157_v16  ;;  %v717_v4 = vpop.permute.xlu0 %716 }
 0x14e   : > { %1160 = vmatpush3.bf16.msra.mxu1 %v1157_v16 }
 0x151   : > { %1086 = vmatmul.mubr.msk.f32.vlgmr.msra.gmra.mrb[0].mxu1 %vm377_vm0, %v548_v17  ;;  %v852_v17 = vpop.permute.xlu0 %851 }
 0x152   : > { %1088 = vmatprep.mubr.msk.f32.mxu1 %vm377_vm0, %v549_v18 }
 0x155   : > { %1089 = vmatmul.mubr.msk.f32.gmra.mrb[2].mxu1 %vm377_vm0, %v550_v19  ;;  %v857_v19 = vpop.permute.xlu1 %856 }
 0x156   : > { %1099 = vmatprep.mubr.msk.f32.mxu1 %vm377_vm0, %v696_v20 }
 0x224   : > { %v1087_v23 = vpop.f32.mrb[0].mxu1 }
 0x225   : > { %v659_v24 = vadd.f32 %v1087_v23, %v563_v21  ;;  %v653_v25 = vpop.f32.mrb[1].mxu1 }
 0x226   : > { %v654_v26 = vadd.f32 %v653_v25, %v558_v22 }
 0x227   : > { %v677_v27 = vmin.f32 %v659_v24, 0.0  ;;  %vm673_vm6 = vcmp.gt.f32.partialorder %v659_v24, 0.0 }
 0x228   : > { %v676_v29 = vmin.f32 %v654_v26, 0.0  ;;  %v1090_v30 = vpop.f32.mrb[2].mxu1  ;;  %vm672_vm7 = vcmp.gt.f32.partialorder %v654_v26, 0.0 }
 0x229   : > { %v682_v32 = vmul.f32 1.442695, %v677_v27  ;;  %v669_v33 = vadd.f32 %v1090_v30, %v573_v28  ;;  %v663_v34 = vpop.f32.mrb[3].mxu1 }
 0x22a   : > { %v680_v35 = vmul.f32 1.442695, %v676_v29  ;;  %v664_v36 = vadd.f32 %v663_v34, %v568_v31  ;;  %v862_v29 = vpop.permute.xlu0 %861 }
 0x22b   : > { %1219 = vpow2.f32 %v682_v32  ;;  %v679_v37 = vmin.f32 %v669_v33, 0.0  ;;  %vm675_vm8 = vcmp.gt.f32.partialorder %v669_v33, 0.0 }
 0x22c   : > { %1221 = vpow2.f32 %v680_v35  ;;  %v678_v38 = vmin.f32 %v664_v36, 0.0  ;;  %vm674_vm9 = vcmp.gt.f32.partialorder %v664_v36, 0.0 }
 0x22d   : > { %v686_v39 = vmul.f32 1.442695, %v679_v37 }
 0x22e   : > { %v684_v40 = vmul.f32 1.442695, %v678_v38 }
 0x22f   : > { %1223 = vpow2.f32 %v686_v39 }
 0x230   : > { %1225 = vpow2.f32 %v684_v40 }
 0x235   : > { %v1220_v41 = vpop.eup %1219 }
 0x236   : > { %v1222_v42 = vpop.eup %1221  ;;  %v989_v43 = vadd.f32 -1.0, %v1220_v41 }
 0x237   : > { %v988_v44 = vadd.f32 -1.0, %v1222_v42  ;;  %v883_v42 = vstv %s882_s15 }
 0x238   : > { %v693_v45 = vsel %vm673_vm6, %v659_v24, %v989_v43 }
 0x239   : > { %v1224_v46 = vpop.eup %1223  ;;  %v692_v47 = vsel %vm672_vm7, %v654_v26, %v988_v44 }
 0x23a   : > { %v1226_v48 = vpop.eup %1225  ;;  %v991_v49 = vadd.f32 -1.0, %v1224_v46  ;;  %v1161_v50 = vpack.c.bf16 %v693_v45, %v692_v47 }
 0x23b   : > { %v990_v51 = vadd.f32 -1.0, %v1226_v48 }
 0x23c   : > { %1162 = vmatprep.subr.bf16.mxu1 %v1161_v50  ;;  %v695_v52 = vsel %vm675_vm8, %v669_v33, %v991_v49  ;;  %v867_v33 = vpop.permute.xlu1 %866 }
 0x23d   : > { %1164 = vmatpush3.bf16.msra.mxu1 %v1161_v50  ;;  %v694_v53 = vsel %vm674_vm9, %v664_v36, %v990_v51 }
 0x23e   : > { %v1165_v54 = vpack.c.bf16 %v695_v52, %v694_v53 }
 0x240   : > { %1166 = vmatprep.subr.bf16.mxu1 %v1165_v54 }
 0x241   : > { %1168 = vmatpush3.bf16.msra.mxu1 %v1165_v54 }
 0x244   : > { %1100 = vmatmul.mubr.msk.f32.vlgmr.msra.gmra.mrb[4].mxu1 %vm377_vm0, %v697_v55 }
 0x245   : > { %1102 = vmatprep.mubr.msk.f32.mxu1 %vm377_vm0, %v698_v56 }
 0x248   : > { %1103 = vmatmul.mubr.msk.f32.gmra.mrb[6].mxu1 %vm377_vm0, %v699_v57 }
 0x317   : > { %v1101_v60 = vpop.f32.mrb[4].mxu1 }
 0x318   : > { %v808_v61 = vadd.f32 %v1101_v60, %v712_v58  ;;  %v802_v62 = vpop.f32.mrb[5].mxu1 }
 0x319   : > { %v803_v63 = vadd.f32 %v802_v62, %v707_v59 }
 0x31a   : > { %v826_v0 = vmin.f32 %v808_v61, 0.0  ;;  %vm822_vm10 = vcmp.gt.f32.partialorder %v808_v61, 0.0 }
 0x31b   : > { %v825_v2 = vmin.f32 %v803_v63, 0.0  ;;  %v1104_v3 = vpop.f32.mrb[6].mxu1  ;;  %vm821_vm11 = vcmp.gt.f32.partialorder %v803_v63, 0.0 }
 0x31c   : > { %v831_v5 = vmul.f32 1.442695, %v826_v0  ;;  %v818_v6 = vadd.f32 %v1104_v3, %v722_v1  ;;  %v812_v7 = vpop.f32.mrb[7].mxu1 }
 0x31d   : > { %v829_v8 = vmul.f32 1.442695, %v825_v2  ;;  %v813_v9 = vadd.f32 %v812_v7, %v717_v4 }
 0x31e   : > { %1227 = vpow2.f32 %v831_v5  ;;  %v828_v10 = vmin.f32 %v818_v6, 0.0  ;;  %vm824_vm12 = vcmp.gt.f32.partialorder %v818_v6, 0.0 }
 0x31f   : > { %1229 = vpow2.f32 %v829_v8  ;;  %v827_v11 = vmin.f32 %v813_v9, 0.0  ;;  %vm823_vm13 = vcmp.gt.f32.partialorder %v813_v9, 0.0 }
 0x320   : > { %v835_v12 = vmul.f32 1.442695, %v828_v10 }
 0x321   : > { %v833_v13 = vmul.f32 1.442695, %v827_v11 }
 0x322   : > { %1231 = vpow2.f32 %v835_v12 }
 0x323   : > { %1233 = vpow2.f32 %v833_v13 }
 0x328   : > { %v1228_v14 = vpop.eup %1227 }
 0x329   : > { %v1230_v15 = vpop.eup %1229  ;;  %v997_v16 = vadd.f32 -1.0, %v1228_v14 }
 0x32a   : > { %v996_v18 = vadd.f32 -1.0, %v1230_v15 }
 0x32b   : > { %v842_v20 = vsel %vm822_vm10, %v808_v61, %v997_v16 }
 0x32c   : > { %v1232_v21 = vpop.eup %1231  ;;  %v870_v22 = vmul.f32 %v857_v19, %v842_v20  ;;  %v841_v23 = vsel %vm821_vm11, %v803_v63, %v996_v18 }
 0x32d   : > { %v1234_v24 = vpop.eup %1233  ;;  %v869_v25 = vmul.f32 %v852_v17, %v841_v23  ;;  %v999_v26 = vadd.f32 -1.0, %v1232_v21 }
 0x32e   : > { %v998_v27 = vadd.f32 -1.0, %v1234_v24 }
 0x32f   : > { %v873_v28 = vadd.f32 %v870_v22, %v869_v25  ;;  %v844_v30 = vsel %vm824_vm12, %v818_v6, %v999_v26 }
 0x330   : > { %v843_v31 = vsel %vm823_vm13, %v813_v9, %v998_v27  ;;  %v872_v34 = vmul.f32 %v867_v33, %v844_v30 }
 0x331   : > { %v871_v32 = vmul.f32 %v862_v29, %v843_v31 }
 0x333   : > { %v874_v35 = vadd.f32 %v873_v28, %v871_v32 }
 0x335   : > { %v875_v36 = vadd.f32 %v874_v35, %v872_v34 }
 0x337   : > { %v876_v37 = vrot.slane %v875_v36, 4 }
 0x339   : > { %v877_v38 = vadd.f32 %v876_v37, %v875_v36 }
 0x33b   : > { %v878_v39 = vrot.slane %v877_v38, 2 }
 0x33d   : > { %v879_v40 = vadd.f32 %v878_v39, %v877_v38 }
 0x33f   : > { %v880_v41 = vrot.slane %v879_v40, 1 }
 0x341   : > { %v881_v43 = vadd.f32 %v880_v41, %v879_v40 }
 0x343   : > { %v884_v44 = vadd.f32 %v883_v42, %v881_v43 }
 0x345   : > { %885 = vst [vmem:[%s326_s18] sm:$0x1] %v884_v44 }
 0x346   : > { %1248 = shalt.err (!%p1245_p3)
}
 0x347   : > { %s1249_s22 = scalar_lea.hbm %s1563_s27, 16  ;;  %s1253_s17 = scalar_lea.hbm %s1614_s9, 48 }
 0x348   : > { %p1250_p4 = scmp.ne.s32.totalorder %s1563_s27, %s1249_s22  ;;  %p1254_p9 = scmp.lt.u32.totalorder %s1563_s27, %s1614_s9 }
 0x349   : > { %p1255_p10 = scmp.lt.u32.totalorder %s1253_s17, %s1249_s22  ;;  %p1257_p12 = scmp.lt.u32.totalorder %s1249_s22, %s1563_s27 }
 0x34a   : > { %p1251_p7 = pnand %p1250_p4, %p1389_p5 }
 0x34b   : > { %p1256_p11 = por %p1255_p10, %p1254_p9 }
 0x34c   : > { %p1252_p8 = pneg %p1251_p7 }
 0x34d   : > { %p1258_p13 = por %p1257_p12, %p1256_p11 }
 0x34f   : > { %p1259_p0 = pnand %p1258_p13, %p1252_p8 }
 0x351   : > { %1262 = shalt.err (!%p1259_p0)
}
 0x352   : > { %1169 = dma.vmem_to_hbm [thread:$0]  (%p1389_p5), %s1565_s23, 16, %s1563_s27, %s887_s28  }
 0x353 PF: > { %p1175_p1 = scmp.ge.s32.totalorder %s1297_s14, 2  ;;  %s911_s26 = sand.u32 1, %s1285_s11  }
 0x354   : > { %s912_s24 = scalar_lea.sflag [#allocation4], %s911_s26 }
 0x355   : > { %p1172_p2 = pnand %p1175_p1, %p1393_p6 }
 0x357   : > { %1280 = dma.done.wait (!%p1172_p2), %s912_s24, 16  }
 0x358   : > { %1282 = vsyncadd (!%p1172_p2), %s912_s24, 4294967280  ;;  %p20_p3 = scmp.ge.s32.totalorder %s1377_s16, 5   ;;  %s1619_s11 = smov %s1289_s12 }
 0x359   : > { %s1620_s12 = smov %s1293_s13  ;;  %s1621_s13 = smov %s1387_s19 }
 0x35a   : > { %s1622_s14 = smov %s1377_s16  ;;  %22 = sbr.rel (!%p20_p3) target bundleno = 5 (0x5), region = 91 }
 0x361   :  { %916 = vsyncpa [#allocation4], 1 }
 0x362   :  { %918 = vsyncpa [#allocation4 + $0x1], 1 }

</bundles_post_ra>
